<compile_context>
chip_gen: v7x
topology: tpu7x:2x2x1
jax: 0.10.0
libtpu: 0.0.40
codegen_flags: <defaults>
</compile_context>

<pallas_src>
import jax
import jax.numpy as jnp
from jax.experimental import pallas as pl
from jax.experimental.pallas import tpu as pltpu

_LANES = 128
_SUBLANES = 8


def _gelu_kernel(x_ref, o_ref):
    x = x_ref[...]
    # Upcast to f32 only inside the kernel (HBM traffic stays native-width).
    xf = x.astype(jnp.float32)
    # Matches the CUDA kernel:
    #   cdf = 0.5 * (1 + tanh(0.7978845608 * (x + 0.044715 * x^3)))
    inner = 0.7978845608 * xf * (1.0 + 0.044715 * xf * xf)
    cdf = 0.5 * (1.0 + jnp.tanh(inner))
    o_ref[...] = (xf * cdf).astype(o_ref.dtype)


def gelu_pallas(x, *, max_tile_rows=2048):
    """Elementwise tanh-approx GELU on an arbitrarily shaped array."""
    orig_shape = x.shape
    dtype = x.dtype
    n = x.size

    # Fast path (no pad / no slice) whenever n is a multiple of the lane width.
    if n % _LANES == 0:
        flat = x.reshape(-1)
        pad = 0
    else:
        # Rare fallback: pad up to a whole (8,128) tile, slice afterwards.
        tile_elems = _SUBLANES * _LANES
        n_pad = pl.cdiv(n, tile_elems) * tile_elems
        pad = n_pad - n
        flat = jnp.concatenate([x.reshape(-1), jnp.zeros((pad,), dtype)])

    rows = flat.size // _LANES
    x2d = flat.reshape(rows, _LANES)

    if rows <= max_tile_rows:
        # Single block covering the full array (allowed even if rows % 8 != 0).
        tile_rows = rows
        grid = (1,)
    else:
        # max_tile_rows is a multiple of 8, so (tile_rows, 128) is tile-aligned;
        # a ragged last block (rows % tile_rows != 0) is masked by Pallas.
        tile_rows = max_tile_rows
        grid = (pl.cdiv(rows, tile_rows),)

    out2d = pl.pallas_call(
        _gelu_kernel,
        out_shape=jax.ShapeDtypeStruct((rows, _LANES), dtype),
        grid_spec=pltpu.PrefetchScalarGridSpec(
            num_scalar_prefetch=0,
            grid=grid,
            in_specs=[pl.BlockSpec((tile_rows, _LANES), lambda i: (i, 0))],
            out_specs=pl.BlockSpec((tile_rows, _LANES), lambda i: (i, 0)),
        ),
        compiler_params=pltpu.CompilerParams(
            dimension_semantics=("parallel",),
        ),
    )(x2d)

    out_flat = out2d.reshape(-1)
    if pad:
        out_flat = out_flat[:n]
    return out_flat.reshape(orig_shape)


if __name__ == "__main__":
    key = jax.random.PRNGKey(0)
    # Small NCHW-like input consistent with an elementwise activation module.
    x = jax.random.normal(key, (2, 4, 16, 16), dtype=jnp.float32)

    y = gelu_pallas(x)
    jax.block_until_ready(y)

    # Reference check (pure JAX, same tanh-approx GELU formula).
    ref = x * 0.5 * (1.0 + jnp.tanh(0.7978845608 * (x + 0.044715 * x ** 3)))
    assert y.shape == x.shape and y.dtype == x.dtype
    assert jnp.max(jnp.abs(y - ref)) < 1e-5

    print("KERNEL_OK")
</pallas_src>

<mosaic_0001>
module attributes {stable_mosaic.version = 11 : i64} {
  func.func @_gelu_kernel(%arg0: i32, %arg1: memref<16x128xf32, #tpu.memory_space<vmem>>, %arg2: memref<16x128xf32, #tpu.memory_space<vmem>>) attributes {dimension_semantics = [#tpu.dimension_semantics<parallel>], iteration_bounds = array<i64: 1>, scalar_prefetch = 0 : i64, scratch_operands = 0 : i64, tpu.core_type = #tpu.core_type<tc>, window_params = [{transform_indices = @transform_0, window_bounds = array<i64: 16, 128>}, {transform_indices = @transform_1, window_bounds = array<i64: 16, 128>}]} {
    %c0 = arith.constant 0 : index
    %c0_0 = arith.constant 0 : index
    %0 = vector.load %arg1[%c0, %c0_0] : memref<16x128xf32, #tpu.memory_space<vmem>>, vector<16x128xf32>
    %cst = arith.constant 0.797884583 : f32
    %1 = vector.broadcast %cst : f32 to vector<16x128xf32>
    %2 = arith.mulf %1, %0 : vector<16x128xf32>
    %cst_1 = arith.constant 4.471500e-02 : f32
    %3 = vector.broadcast %cst_1 : f32 to vector<16x128xf32>
    %4 = arith.mulf %3, %0 : vector<16x128xf32>
    %5 = arith.mulf %4, %0 : vector<16x128xf32>
    %cst_2 = arith.constant 1.000000e+00 : f32
    %6 = vector.broadcast %cst_2 : f32 to vector<16x128xf32>
    %7 = arith.addf %6, %5 : vector<16x128xf32>
    %8 = arith.mulf %2, %7 : vector<16x128xf32>
    %9 = math.tanh %8 : vector<16x128xf32>
    %cst_3 = arith.constant 1.000000e+00 : f32
    %10 = vector.broadcast %cst_3 : f32 to vector<16x128xf32>
    %11 = arith.addf %10, %9 : vector<16x128xf32>
    %cst_4 = arith.constant 5.000000e-01 : f32
    %12 = vector.broadcast %cst_4 : f32 to vector<16x128xf32>
    %13 = arith.mulf %12, %11 : vector<16x128xf32>
    %14 = arith.mulf %0, %13 : vector<16x128xf32>
    %c0_5 = arith.constant 0 : index
    %c0_6 = arith.constant 0 : index
    %15 = vector.load %arg2[%c0_5, %c0_6] : memref<16x128xf32, #tpu.memory_space<vmem>>, vector<16x128xf32>
    tpu.vector_store %arg2[%c0_5, %c0_6], %14 {strides = array<i32>} : memref<16x128xf32, #tpu.memory_space<vmem>>, vector<16x128xf32>,
    return
  }
  func.func @transform_0(%arg0: i32) -> (i32, i32) {
    %c0_i32 = arith.constant 0 : i32
    %c0_i32_0 = arith.constant 0 : i32
    return %arg0, %c0_i32 : i32, i32
  }
  func.func @transform_1(%arg0: i32) -> (i32, i32) {
    %c0_i32 = arith.constant 0 : i32
    %c0_i32_0 = arith.constant 0 : i32
    return %arg0, %c0_i32 : i32, i32
  }
}

</mosaic_0001>

<bundles_post_ra>
// kernel: tpu_custom_call.1
= control target key start
LH: loop header
LB: loop body
LE: loop exit
PB: predicated region body
PF: predicated region fallthrough
CT: control target
= control target key end

     0   :  { %6 = vsyncpa [#allocation3], 0  ;;  %s162_s0 = inlined_call_operand.hbm [shape: f32[16,128], index: 0, kind: input, shape index: {}]   ;;  %s163_s1 = inlined_call_operand.hbm [shape: f32[16,128], index: 1, kind: output, shape index: {}]  }
   0x1   :  { %7 = vsyncpa [#allocation4], 0  ;;  %s118_s6 = smov [#allocation2]   ;;  %s70_s10 = scalar_lea.hbm %s162_s0, 256 }
   0x2   :  { %s13_s7 = sshll.u32 %s118_s6, 4  ;;  %p71_p0 = scmp.ne.s32.totalorder %s162_s0, %s70_s10  ;;  %s14_s7 = int_to_ptr.vmem [resolvable:$true] %s13_s7 }
   0x3   :  { %p74_p1 = scmp.lt.u32.totalorder %s70_s10, %s162_s0 }
   0x5   :  { %p76_p2 = pnand %p74_p1, %p71_p0 }
   0x7   :  { %79 = shalt.err (!%p76_p2)
}
   0x8   :  { %s80_s15 = scalar_lea.vmem %s14_s7, 256  ;;  %p85_p4 = scmp.lt.s32.totalorder %s14_s7, %s14_s7 }
   0x9   :  { %p81_p3 = scmp.ne.s32.totalorder %s14_s7, %s80_s15  ;;  %p86_p5 = scmp.lt.s32.totalorder %s80_s15, %s80_s15 }
   0xb   :  { %p87_p6 = por %p86_p5, %p85_p4 }
   0xd   :  { %p88_p7 = pnand %p87_p6, %p81_p3 }
   0xf   :  { %91 = shalt.err (!%p88_p7)
}
  0x10   :  { %s119_s16 = smov 128   ;;  %s120_s17 = smov 8  }
  0x11   :  { %19 = dma.hbm_to_vmem [thread:$0]  %s162_s0, 256, %s14_s7, [#allocation3], %s119_s16, %s119_s16, %s120_s17  }
  0x12   :  { %114 = dma.done.wait [#allocation3], 256  }
  0x13   :  { %115 = vsyncadd [#allocation3], 4294967040  ;;  %v23_v0 = vld [vmem:[#allocation2] sm:$0xff]  ;;  %v24_v1 = vld [vmem:[#allocation2 + $0x8] sm:$0xff]  ;;  %s121_s0 = smov [#allocation5]  }
  0x14   :  { %v27_v2 = vmul.f32 0.044715, %v23_v0  ;;  %v28_v3 = vmul.f32 0.044715, %v24_v1  ;;  %v25_v4 = vmul.f32 0.7978846, %v23_v0 }
  0x15   :  { %v26_v6 = vmul.f32 0.7978846, %v24_v1  ;;  %s50_s20 = sshll.u32 %s121_s0, 4  ;;  %s51_s20 = int_to_ptr.vmem [resolvable:$true] %s50_s20 }
  0x16   :  { %v29_v5 = vmul.f32 %v27_v2, %v23_v0  ;;  %v30_v7 = vmul.f32 %v28_v3, %v24_v1  ;;  %s92_s21 = scalar_lea.vmem %s51_s20, 256  ;;  %p97_p9 = scmp.lt.s32.totalorder %s51_s20, %s51_s20 }
  0x17   :  { %p93_p8 = scmp.ne.s32.totalorder %s51_s20, %s92_s21  ;;  %p98_p10 = scmp.lt.s32.totalorder %s92_s21, %s92_s21 }
  0x18   :  { %v31_v8 = vadd.f32 1.0, %v29_v5  ;;  %v32_v9 = vadd.f32 1.0, %v30_v7 }
  0x19   :  { %p99_p11 = por %p98_p10, %p97_p9 }
  0x1a   :  { %v33_v10 = vmul.f32 %v31_v8, %v25_v4  ;;  %v34_v11 = vmul.f32 %v32_v9, %v26_v6 }
  0x1b   :  { %p100_p12 = pnand %p99_p11, %p93_p8 }
  0x1c   :  { %66 = vtanh.f32 %v33_v10 }
  0x1d   :  { %68 = vtanh.f32 %v34_v11 }
  0x26   :  { %v67_v12 = vpop.eup %66 }
  0x27   :  { %v69_v13 = vpop.eup %68  ;;  %v37_v14 = vadd.f32 1.0, %v67_v12 }
  0x28   :  { %v38_v15 = vadd.f32 1.0, %v69_v13 }
  0x29   :  { %v39_v16 = vmul.f32 0.5, %v37_v14 }
  0x2a   :  { %v40_v17 = vmul.f32 0.5, %v38_v15 }
  0x2b   :  { %v41_v18 = vmul.f32 %v39_v16, %v23_v0 }
  0x2c   :  { %v42_v19 = vmul.f32 %v40_v17, %v24_v1 }
  0x2d   :  { %43 = vst [vmem:[#allocation5] sm:$0xff] %v41_v18 }
  0x2e   :  { %44 = vst [vmem:[#allocation5 + $0x8] sm:$0xff] %v42_v19 }
  0x2f   :  { %103 = shalt.err (!%p100_p12)
}
  0x30   :  { %s104_s24 = scalar_lea.hbm %s163_s1, 256 }
  0x31   :  { %p105_p13 = scmp.ne.s32.totalorder %s163_s1, %s104_s24  ;;  %p108_p0 = scmp.lt.u32.totalorder %s104_s24, %s163_s1 }
  0x33   :  { %p110_p1 = pnand %p108_p0, %p105_p13 }
  0x35   :  { %113 = shalt.err (!%p110_p1)
}
  0x36   :  { %56 = dma.vmem_to_hbm [thread:$0]  %s51_s20, 256, %s163_s1, [#allocation4], %s119_s16, %s119_s16, %s120_s17  }
  0x37   :  { %116 = dma.done.wait [#allocation4], 256  }
  0x38   :  { %117 = vsyncadd [#allocation4], 4294967040 }
  0x39   :  { %60 = vsyncpa [#allocation3], 1 }
  0x3a   :  { %61 = vsyncpa [#allocation4], 1 }

</bundles_post_ra>
